<compile_context>
chip_gen: v7x
topology: tpu7x:2x2x1
jax: 0.10.0
libtpu: 0.0.40
codegen_flags: <defaults>
</compile_context>

<pallas_src>
import jax
import jax.numpy as jnp
from jax.experimental import pallas as pl
from jax.experimental.pallas import tpu as pltpu


LANE = 512            # lane-dense last dim (multiple of 128 -> unmasked full-width vst)
TILE_R_MAX = 4096     # 4096 x 512 f32 = 8 MiB tile; double-buffered in+out = 32 MiB
_PALLAS_MIN_ELEMS = 1 << 16   # below ~256 KiB f32, let XLA fuse the scalar multiply


def _scale_kernel(w_ref, x_ref, o_ref):
    # w_ref: SMEM scalar (shape (1,)); x_ref/o_ref: (tile_r, LANE) VMEM tiles.
    o_ref[...] = x_ref[...] * w_ref[0]


def _round_up(v, m):
    return ((v + m - 1) // m) * m


def _pick_tile_r(rows):
    """Tile-row count: big tiles amortize the ~0.35us/grid-step overhead, but
    always produce >= 2 grid tiles when possible so both v7x TensorCores get
    work (no effect on single-TC v5e/v6e)."""
    if rows < 16:
        return rows                                     # tiny: one full-extent block
    if rows <= 2 * TILE_R_MAX:
        return min(TILE_R_MAX, _round_up(pl.cdiv(rows, 2), 8))   # exactly 2 tiles
    return TILE_R_MAX


def _scale_pallas(x2d, w, tile_r, donate):
    rows, lane = x2d.shape
    num_tiles = pl.cdiv(rows, tile_r)
    itemsize = jnp.dtype(x2d.dtype).itemsize
    tile_bytes = tile_r * lane * itemsize
    # 2 pipeline buffers each for input & output plus headroom for compiler
    # scratch; clamp to stay within v7x's 64 MiB-per-core physical VMEM (and
    # above the 16/32 MiB scoped defaults on v5e/v6e/v7x).
    vmem_limit = min(max(4 * tile_bytes + (8 << 20), 32 << 20), 48 << 20)
    return pl.pallas_call(
        _scale_kernel,
        out_shape=jax.ShapeDtypeStruct(x2d.shape, x2d.dtype),
        grid=(num_tiles,),
        in_specs=[
            pl.BlockSpec(memory_space=pltpu.SMEM),            # scalar w (whole array)
            pl.BlockSpec((tile_r, lane), lambda i: (i, 0)),   # lane-dense input tile
        ],
        out_specs=pl.BlockSpec((tile_r, lane), lambda i: (i, 0)),
        compiler_params=pltpu.CompilerParams(
            dimension_semantics=("parallel",),
            vmem_limit_bytes=vmem_limit,
        ),
        cost_estimate=pl.CostEstimate(
            flops=rows * lane,
            bytes_accessed=2 * rows * lane * itemsize,
            transcendentals=0,
        ),
        # Alias x2d (input index 1, after w) onto the output only when the
        # caller donates x; aliasing a live buffer would force an XLA copy.
        input_output_aliases=({1: 0} if donate else {}),
    )(w, x2d)


def gautoencoder_forward(x, w, *, force_pallas=False, donate=False):
    """Pallas equivalent of GAutoEncoder.forward: out = w * x.

    x: any-shape float32 tensor (the module uses NCHW [B, C, H, W])
    w: scalar parameter, shape (1,) float32
    """
    total = x.size

    # Plain-JAX fallback:
    #   * tiny tensors (kernel launch / DMA setup dwarfs the data movement),
    #   * sizes not divisible by LANE (pad + slice would cost up to ~3x HBM
    #     traffic on a bandwidth-bound op; XLA's fused multiply is already at
    #     HBM roofline there).
    if total % LANE != 0 or (total < _PALLAS_MIN_ELEMS and not force_pallas):
        return w[0] * x

    rows = total // LANE
    x2d = x.reshape(rows, LANE)       # pure reshape: no data movement for contiguous x
    tile_r = _pick_tile_r(rows)
    out2d = _scale_pallas(x2d, w, tile_r, donate)
    return out2d.reshape(x.shape)


# TODO(synk): the PyTorch forward has dead code after `return self.w * x`
# (`self.decoder(self.encoder(x))` is unreachable and those modules are never
# defined); only the reachable scale path is implemented.


if __name__ == "__main__":
    key = jax.random.PRNGKey(0)
    k_small, k_rag, k_med = jax.random.split(key, 3)

    # Deterministic parameter init, matching nn.Parameter(torch.Tensor([0.1]))
    w = jnp.array([0.1], dtype=jnp.float32)

    # 1) Small NCHW input from the module spec (2048 elems = 4 lane-dense rows);
    #    force the Pallas path so the kernel itself is exercised.
    x_small = jax.random.normal(k_small, (2, 4, 16, 16), dtype=jnp.float32)
    out_small = gautoencoder_forward(x_small, w, force_pallas=True)
    jax.block_until_ready(out_small)
    ref_small = w[0] * x_small
    assert out_small.shape == x_small.shape and out_small.dtype == x_small.dtype
    assert jnp.allclose(out_small, ref_small, atol=1e-6, rtol=1e-6)

    # 1b) Same small input through the default dispatch (plain-JAX fast path).
    out_small2 = gautoencoder_forward(x_small, w)
    jax.block_until_ready(out_small2)
    assert jnp.allclose(out_small2, ref_small, atol=1e-6, rtol=1e-6)

    # 2) Ragged grid test: 15360 elems -> 30 rows, tile_r=16 -> 2 tiles with a
    #    masked (14-row) last block.
    x_rag = jax.random.normal(k_rag, (3, 5, 16, 64), dtype=jnp.float32)
    out_rag = gautoencoder_forward(x_rag, w, force_pallas=True)
    jax.block_until_ready(out_rag)
    assert jnp.allclose(out_rag, w[0] * x_rag, atol=1e-6, rtol=1e-6)

    # 3) Size not divisible by 512 -> plain-JAX fallback (no pad/slice copies).
    x_odd = jax.random.normal(k_rag, (2, 3, 7, 11), dtype=jnp.float32)
    out_odd = gautoencoder_forward(x_odd, w)
    jax.block_until_ready(out_odd)
    assert jnp.allclose(out_odd, w[0] * x_odd, atol=1e-6, rtol=1e-6)

    # 4) Larger input: 1,048,576 elems = 2048 rows -> two 1024-row tiles
    #    (keeps both v7x TensorCores busy; exercises multi-tile pipelining).
    x_med = jax.random.normal(k_med, (8, 16, 64, 128), dtype=jnp.float32)
    out_med = gautoencoder_forward(x_med, w)
    jax.block_until_ready(out_med)
    ref_med = w[0] * x_med
    assert out_med.shape == x_med.shape and out_med.dtype == x_med.dtype
    assert jnp.allclose(out_med, ref_med, atol=1e-6, rtol=1e-6)

    print("KERNEL_OK")
</pallas_src>

<mosaic_0001>
module attributes {stable_mosaic.version = 11 : i64} {
  func.func @_scale_kernel(%arg0: i32, %arg1: memref<1xf32, #tpu.memory_space<smem>>, %arg2: memref<4x512xf32, #tpu.memory_space<vmem>>, %arg3: memref<4x512xf32, #tpu.memory_space<vmem>>) attributes {dimension_semantics = [#tpu.dimension_semantics<parallel>], iteration_bounds = array<i64: 1>, scalar_prefetch = 0 : i64, scratch_operands = 0 : i64, tpu.core_type = #tpu.core_type<tc>, window_params = [{transform_indices = @transform_0, window_bounds = array<i64: 1>}, {transform_indices = @transform_1, window_bounds = array<i64: 4, 512>}, {transform_indices = @transform_2, window_bounds = array<i64: 4, 512>}]} {
    %c0 = arith.constant 0 : index
    %c0_0 = arith.constant 0 : index
    %0 = vector.load %arg2[%c0, %c0_0] : memref<4x512xf32, #tpu.memory_space<vmem>>, vector<4x512xf32>
    %c0_1 = arith.constant 0 : index
    %1 = memref.load %arg1[%c0_1] : memref<1xf32, #tpu.memory_space<smem>>
    %2 = vector.broadcast %1 : f32 to vector<4x512xf32>
    %3 = arith.mulf %0, %2 : vector<4x512xf32>
    %c0_2 = arith.constant 0 : index
    %c0_3 = arith.constant 0 : index
    %4 = vector.load %arg3[%c0_2, %c0_3] : memref<4x512xf32, #tpu.memory_space<vmem>>, vector<4x512xf32>
    tpu.vector_store %arg3[%c0_2, %c0_3], %3 {strides = array<i32>} : memref<4x512xf32, #tpu.memory_space<vmem>>, vector<4x512xf32>,
    return
  }
  func.func @transform_0(%arg0: i32) -> i32 {
    %c0_i32 = arith.constant 0 : i32
    %c0_i32_0 = arith.constant 0 : i32
    return %c0_i32 : i32
  }
  func.func @transform_1(%arg0: i32) -> (i32, i32) {
    %c0_i32 = arith.constant 0 : i32
    %c0_i32_0 = arith.constant 0 : i32
    return %arg0, %c0_i32 : i32, i32
  }
  func.func @transform_2(%arg0: i32) -> (i32, i32) {
    %c0_i32 = arith.constant 0 : i32
    %c0_i32_0 = arith.constant 0 : i32
    return %arg0, %c0_i32 : i32, i32
  }
}

</mosaic_0001>

<bundles_post_ra>
// kernel: tpu_custom_call.1
= control target key start
LH: loop header
LB: loop body
LE: loop exit
PB: predicated region body
PF: predicated region fallthrough
CT: control target
= control target key end

     0   :  { %8 = vsyncpa [#allocation4], 0  ;;  %s142_s0 = inlined_call_operand.<no memory space> [shape: f32[1], index: 0, kind: input, shape index: {}]   ;;  %s143_s1 = inlined_call_operand.hbm [shape: f32[4,512], index: 1, kind: input, shape index: {}]   ;;  %s144_s2 = inlined_call_operand.hbm [shape: f32[4,512], index: 2, kind: output, shape index: {}]  }
   0x1   :  { %9 = vsyncpa [#allocation5], 0  ;;  %s98_s9 = smov [#allocation3]   ;;  %s50_s13 = scalar_lea.hbm %s143_s1, 256 }
   0x2   :  { %s18_s10 = sshll.u32 %s98_s9, 4  ;;  %p51_p0 = scmp.ne.s32.totalorder %s143_s1, %s50_s13  ;;  %s19_s10 = int_to_ptr.vmem [resolvable:$true] %s18_s10 }
   0x3   :  { %p54_p1 = scmp.lt.u32.totalorder %s50_s13, %s143_s1 }
   0x5   :  { %p56_p2 = pnand %p54_p1, %p51_p0 }
   0x7   :  { %59 = shalt.err (!%p56_p2)
}
   0x8   :  { %s60_s18 = scalar_lea.vmem %s19_s10, 256  ;;  %p65_p4 = scmp.lt.s32.totalorder %s19_s10, %s19_s10 }
   0x9   :  { %p61_p3 = scmp.ne.s32.totalorder %s19_s10, %s60_s18  ;;  %p66_p5 = scmp.lt.s32.totalorder %s60_s18, %s60_s18 }
   0xb   :  { %p67_p6 = por %p66_p5, %p65_p4 }
   0xd   :  { %p68_p7 = pnand %p67_p6, %p61_p3 }
   0xf   :  { %71 = shalt.err (!%p68_p7)
}
  0x10   :  { %21 = dma.hbm_to_vmem [thread:$0]  %s143_s1, 256, %s19_s10, [#allocation4]  }
  0x11   :  { %94 = dma.done.wait [#allocation4], 256  }
  0x12   :  { %95 = vsyncadd [#allocation4], 4294967040  ;;  %v28_v0 = vstv %s142_s0  ;;  %s99_s23 = smov [#allocation6]   ;;  %v25_v1 = vld [vmem:[#allocation3] sm:$0xff]  ;;  %v26_v2 = vld [vmem:[#allocation3 + $0x8] sm:$0xff] }
  0x13   :  { %s39_s24 = sshll.u32 %s99_s23, 4  ;;  %v29_v3 = vmul.f32 %v28_v0, %v25_v1  ;;  %v30_v4 = vmul.f32 %v28_v0, %v26_v2  ;;  %s40_s24 = int_to_ptr.vmem [resolvable:$true] %s39_s24 }
  0x14   :  { %s72_s25 = scalar_lea.vmem %s40_s24, 256  ;;  %p77_p9 = scmp.lt.s32.totalorder %s40_s24, %s40_s24 }
  0x15   :  { %31 = vst [vmem:[#allocation6] sm:$0xff] %v29_v3  ;;  %32 = vst [vmem:[#allocation6 + $0x8] sm:$0xff] %v30_v4  ;;  %p73_p8 = scmp.ne.s32.totalorder %s40_s24, %s72_s25  ;;  %p78_p10 = scmp.lt.s32.totalorder %s72_s25, %s72_s25 }
  0x17   :  { %p79_p11 = por %p78_p10, %p77_p9 }
  0x19   :  { %p80_p12 = pnand %p79_p11, %p73_p8 }
  0x1b   :  { %83 = shalt.err (!%p80_p12)
}
  0x1c   :  { %s84_s0 = scalar_lea.hbm %s144_s2, 256 }
  0x1d   :  { %p85_p13 = scmp.ne.s32.totalorder %s144_s2, %s84_s0  ;;  %p88_p0 = scmp.lt.u32.totalorder %s84_s0, %s144_s2 }
  0x1f   :  { %p90_p1 = pnand %p88_p0, %p85_p13 }
  0x21   :  { %93 = shalt.err (!%p90_p1)
}
  0x22   :  { %42 = dma.vmem_to_hbm [thread:$0]  %s40_s24, 256, %s144_s2, [#allocation5]  }
  0x23   :  { %96 = dma.done.wait [#allocation5], 256  }
  0x24   :  { %97 = vsyncadd [#allocation5], 4294967040 }
  0x25   :  { %46 = vsyncpa [#allocation4], 1 }
  0x26   :  { %47 = vsyncpa [#allocation5], 1 }

</bundles_post_ra>
